<compile_context>
chip_gen: v6e
topology: v6e:2x2x1
jax: 0.10.0
libtpu: 0.0.40
codegen_flags: <defaults>
</compile_context>

<pallas_src>
import functools

import jax
import jax.numpy as jnp
from jax.experimental import pallas as pl
from jax.experimental.pallas import tpu as pltpu


# ----------------------------------------------------------------------------
# Fused single-pass kernel: pool -> FC -> ReLU -> FC -> sigmoid -> scale
# ----------------------------------------------------------------------------
def se_kernel(x_ref, w1_ref, w2_ref, o_ref, *, inv_hw):
    # x_ref:  (Bt, C, HW) block of batch samples, spatial flattened (lane-dense)
    # w1_ref: (C, Cr)  == PyTorch fc[0].weight.T   (Linear(C, C//r, bias=False))
    # w2_ref: (Cr, C)  == PyTorch fc[2].weight.T   (Linear(C//r, C, bias=False))

    # Squeeze: global average pool == dense last-axis reduction, f32 accumulate.
    pooled = jnp.sum(x_ref[...], axis=-1, dtype=jnp.float32) * inv_hw    # (Bt, C)

    # Excitation: Linear -> ReLU -> Linear -> Sigmoid (bias-free). Tiny matmuls;
    # keep weights in their stored dtype and accumulate in f32 on the MXU.
    w1 = w1_ref[...]
    h = jnp.dot(pooled.astype(w1.dtype), w1, preferred_element_type=jnp.float32)
    h = jnp.maximum(h, 0.0)                                              # (Bt, Cr)
    w2 = w2_ref[...]
    s = jnp.dot(h.astype(w2.dtype), w2, preferred_element_type=jnp.float32)
    s = jax.nn.sigmoid(s)                                                # (Bt, C)

    # Scale: re-read the tile straight from the VMEM block (avoid keeping a
    # multi-MiB value live) and broadcast the gates over the lane (HW) axis.
    o_ref[...] = (x_ref[...] * s[:, :, None].astype(x_ref.dtype)).astype(o_ref.dtype)


# ----------------------------------------------------------------------------
# Fallback scale kernel (two-pass path): channel-tiled gate multiply
# ----------------------------------------------------------------------------
def se_scale_kernel(x_ref, g_ref, o_ref):
    # x_ref: (1, Ct, HW); g_ref: (1, Ct, 1) precomputed channel gates (f32)
    o_ref[...] = (x_ref[...] * g_ref[...].astype(x_ref.dtype)).astype(o_ref.dtype)


# ----------------------------------------------------------------------------
# VMEM budget / block-size pickers
# ----------------------------------------------------------------------------
def _vmem_limit_bytes():
    """Usable scoped-VMEM budget for this chip, with headroom for scratch/DMA."""
    try:
        cap = int(pltpu.get_tpu_info().vmem_capacity_bytes)
    except Exception:
        cap = 64 * 1024 * 1024  # conservative default (v7x-sized)
    # Never ask for all of physical VMEM; cap big-VMEM parts at ~112 MiB and
    # leave ~16 MiB headroom everywhere (=> ~48 MiB on v7x, ~112 MiB on v5e/v6e).
    return int(min(max(cap - 16 * 1024 * 1024, 16 * 1024 * 1024), 112 * 1024 * 1024))


def _pick_block_batch(B, C, HW, itemsize, block_budget_bytes, min_steps=4):
    """Largest batch tile that (a) fits 2 in + 2 out double-buffers in budget,
    (b) divides B exactly, and (c) leaves at least `min_steps` grid steps."""
    per_sample = C * HW * itemsize
    max_bt = max(1, block_budget_bytes // (4 * per_sample))
    max_bt = min(max_bt, max(1, B // max(2, min_steps)))  # keep the pipeline fed
    bt = int(min(B, max_bt))
    while B % bt != 0:  # exact grid (no ragged last block)
        bt -= 1
    return bt


def _pick_block_channels(C, HW, itemsize, block_budget_bytes):
    """Largest channel tile (divisor of C, multiple of 8 or full C) fitting budget."""
    best = None
    for d in range(1, C + 1):
        if C % d:
            continue
        if d % 8 and d != C:
            continue
        if 4 * d * HW * itemsize + 1024 <= block_budget_bytes:
            best = d
    return best


# ----------------------------------------------------------------------------
# Wrappers
# ----------------------------------------------------------------------------
def _se_layer_two_pass(x_flat, w1_t, w2_t, B, C, HW, itemsize, block_budget, vmem_limit):
    """Fallback when even a single sample overflows the block budget (v7x, huge
    C*HW): pool + gate in plain XLA (tiny / streaming), channel-tiled Pallas
    kernel for the bandwidth-dominant gate multiply."""
    pooled = jnp.mean(x_flat, axis=-1, dtype=jnp.float32)               # (B, C)
    h = jnp.maximum(jnp.dot(pooled.astype(w1_t.dtype), w1_t,
                            preferred_element_type=jnp.float32), 0.0)
    gates = jax.nn.sigmoid(jnp.dot(h.astype(w2_t.dtype), w2_t,
                                   preferred_element_type=jnp.float32))  # (B, C)
    gates = gates.reshape(B, C, 1).astype(jnp.float32)

    ct = _pick_block_channels(C, HW, itemsize, block_budget)
    if ct is None:
        # TODO(synk): even a single (8, HW) channel slab overflows VMEM; fall back
        # to plain XLA for the multiply rather than adding an HW-tiled grid axis.
        return x_flat * gates.astype(x_flat.dtype)

    out_flat = pl.pallas_call(
        se_scale_kernel,
        out_shape=jax.ShapeDtypeStruct((B, C, HW), x_flat.dtype),
        grid_spec=pltpu.PrefetchScalarGridSpec(
            num_scalar_prefetch=0,
            grid=(B, C // ct),
            in_specs=[
                pl.BlockSpec((1, ct, HW), lambda b, c: (b, c, 0)),
                pl.BlockSpec((1, ct, 1), lambda b, c: (b, c, 0)),
            ],
            out_specs=pl.BlockSpec((1, ct, HW), lambda b, c: (b, c, 0)),
        ),
        compiler_params=pltpu.CompilerParams(
            dimension_semantics=("parallel", "parallel"),
            vmem_limit_bytes=vmem_limit,
        ),
        cost_estimate=pl.CostEstimate(
            flops=B * C * HW,
            transcendentals=0,
            bytes_accessed=2 * B * C * HW * itemsize + B * C * 4,
        ),
    )(x_flat, gates)
    return out_flat


def se_layer(x, w1_t, w2_t, *, block_batch=None, block_budget_bytes=None,
             donate_x=False):
    """x: (B, C, H, W); w1_t: (C, C//r); w2_t: (C//r, C)."""
    B, C, H, W = x.shape
    HW = H * W
    Cr = w1_t.shape[1]
    itemsize = jnp.dtype(x.dtype).itemsize
    w_itemsize = jnp.dtype(w1_t.dtype).itemsize

    vmem_limit = _vmem_limit_bytes()
    weight_bytes = (w1_t.size + w2_t.size) * w_itemsize
    if block_budget_bytes is None:
        block_budget_bytes = vmem_limit - weight_bytes - 2 * 1024 * 1024

    # Lane-dense view: spatial flattened into the last (lane) dimension.
    # TODO(synk): for SE stages where H*W is not a multiple of 128 (49/196/784/...)
    # a channel-last (Bt, HW, C) tiling would keep output stores lane-dense.
    x_flat = x.reshape(B, C, HW)

    # If even a single sample overflows the budget, use the two-pass fallback.
    if 4 * C * HW * itemsize > block_budget_bytes:
        return _se_layer_two_pass(x_flat, w1_t, w2_t, B, C, HW, itemsize,
                                  block_budget_bytes, vmem_limit).reshape(B, C, H, W)

    bt = block_batch if block_batch is not None else _pick_block_batch(
        B, C, HW, itemsize, block_budget_bytes)
    grid = (B // bt,)

    kernel = functools.partial(se_kernel, inv_hw=1.0 / HW)

    out_flat = pl.pallas_call(
        kernel,
        out_shape=jax.ShapeDtypeStruct((B, C, HW), x.dtype),
        grid_spec=pltpu.PrefetchScalarGridSpec(
            num_scalar_prefetch=0,
            grid=grid,
            in_specs=[
                pl.BlockSpec((bt, C, HW), lambda b: (b, 0, 0)),
                pl.BlockSpec((C, Cr), lambda b: (0, 0)),   # weights stay resident
                pl.BlockSpec((Cr, C), lambda b: (0, 0)),
            ],
            out_specs=pl.BlockSpec((bt, C, HW), lambda b: (b, 0, 0)),
        ),
        compiler_params=pltpu.CompilerParams(
            dimension_semantics=("parallel",),      # batch tiles shard across TCs
            vmem_limit_bytes=vmem_limit,
        ),
        cost_estimate=pl.CostEstimate(
            flops=B * C * HW                        # pooling adds
            + 2 * B * C * Cr * 2                    # two tiny FCs
            + B * C * HW,                           # final gate multiply
            transcendentals=B * C,                  # sigmoid
            bytes_accessed=2 * B * C * HW * itemsize + 2 * C * Cr * w_itemsize,
        ),
        input_output_aliases=({0: 0} if donate_x else {}),
    )(x_flat, w1_t, w2_t)

    return out_flat.reshape(B, C, H, W)


def se_layer_ref(x, w1_t, w2_t):
    """Pure-JAX reference matching the PyTorch forward."""
    pooled = jnp.mean(x, axis=(2, 3))                       # (B, C)
    h = jnp.maximum(pooled @ w1_t, 0.0)                     # (B, Cr)
    s = jax.nn.sigmoid(h @ w2_t)                            # (B, C)
    return x * s[:, :, None, None]


if __name__ == "__main__":
    # Small but representative: B=8 so the batched grid has >= 4 steps with the
    # new picker, C=32, reduction=16 -> Cr=2, H*W=256 (multiple of 128 -> lane-dense).
    B, C, H, W = 8, 32, 16, 16
    reduction = 16
    Cr = C // reduction  # 2

    key = jax.random.PRNGKey(0)
    kx, k1, k2 = jax.random.split(key, 3)

    x = jax.random.normal(kx, (B, C, H, W), dtype=jnp.float32)
    # Deterministic synthetic weights (shapes match nn.Linear(C, Cr) / nn.Linear(Cr, C));
    # stored already-transposed so the kernel does y @ W.T directly.
    w1_t = jax.random.normal(k1, (C, Cr), dtype=jnp.float32) * (1.0 / jnp.sqrt(C))
    w2_t = jax.random.normal(k2, (Cr, C), dtype=jnp.float32) * (1.0 / jnp.sqrt(Cr))

    ref = se_layer_ref(x, w1_t, w2_t)

    # Main fused single-pass path.
    out = jax.block_until_ready(se_layer(x, w1_t, w2_t))
    assert out.shape == (B, C, H, W)
    assert jnp.allclose(out, ref, atol=1e-5, rtol=1e-5), "mismatch vs reference (fused)"

    # Force the two-pass fallback (tiny block budget) to exercise that path too.
    out2 = jax.block_until_ready(
        se_layer(x, w1_t, w2_t, block_budget_bytes=48 * 1024))
    assert jnp.allclose(out2, ref, atol=1e-5, rtol=1e-5), "mismatch vs reference (two-pass)"

    print("KERNEL_OK")
</pallas_src>

<mosaic_0001>
module attributes {stable_mosaic.version = 11 : i64} {
  func.func @se_kernel(%arg0: i32, %arg1: memref<2x32x256xf32, #tpu.memory_space<vmem>>, %arg2: memref<32x2xf32, #tpu.memory_space<vmem>>, %arg3: memref<2x32xf32, #tpu.memory_space<vmem>>, %arg4: memref<2x32x256xf32, #tpu.memory_space<vmem>>) attributes {dimension_semantics = [#tpu.dimension_semantics<parallel>], iteration_bounds = array<i64: 4>, scalar_prefetch = 0 : i64, scratch_operands = 0 : i64, tpu.core_type = #tpu.core_type<tc>, window_params = [{transform_indices = @transform_0, window_bounds = array<i64: 2, 32, 256>}, {pipeline_mode = #tpu.pipeline_mode<synchronous>, transform_indices = @transform_1, window_bounds = array<i64: 32, 2>}, {pipeline_mode = #tpu.pipeline_mode<synchronous>, transform_indices = @transform_2, window_bounds = array<i64: 2, 32>}, {transform_indices = @transform_3, window_bounds = array<i64: 2, 32, 256>}]} {
    %c0 = arith.constant 0 : index
    %c0_0 = arith.constant 0 : index
    %c0_1 = arith.constant 0 : index
    %0 = vector.load %arg1[%c0, %c0_0, %c0_1] : memref<2x32x256xf32, #tpu.memory_space<vmem>>, vector<2x32x256xf32>
    %cst = arith.constant dense<0.000000e+00> : vector<2x32xf32>
    %1 = vector.multi_reduction <add>, %0, %cst [2] : vector<2x32x256xf32> to vector<2x32xf32>
    %cst_2 = arith.constant 3.906250e-03 : f32
    %2 = vector.broadcast %cst_2 : f32 to vector<2x32xf32>
    %3 = arith.mulf %1, %2 : vector<2x32xf32>
    %c0_3 = arith.constant 0 : index
    %c0_4 = arith.constant 0 : index
    %4 = vector.load %arg2[%c0_3, %c0_4] : memref<32x2xf32, #tpu.memory_space<vmem>>, vector<32x2xf32>
    %cst_5 = arith.constant dense<0.000000e+00> : vector<2x2xf32>
    %5 = tpu.matmul %3, %4, %cst_5 {dimension_numbers = #tpu.dot_dimension_numbers<[1], [0], [0], [1], [0, 0, 1, 1], [], []>} : vector<2x32xf32>, vector<32x2xf32>, vector<2x2xf32> -> vector<2x2xf32>
    %cst_6 = arith.constant 0.000000e+00 : f32
    %6 = vector.broadcast %cst_6 : f32 to vector<2x2xf32>
    %7 = arith.maximumf %5, %6 : vector<2x2xf32>
    %c0_7 = arith.constant 0 : index
    %c0_8 = arith.constant 0 : index
    %8 = vector.load %arg3[%c0_7, %c0_8] : memref<2x32xf32, #tpu.memory_space<vmem>>, vector<2x32xf32>
    %cst_9 = arith.constant dense<0.000000e+00> : vector<2x32xf32>
    %9 = tpu.matmul %7, %8, %cst_9 {dimension_numbers = #tpu.dot_dimension_numbers<[1], [0], [0], [1], [0, 0, 1, 1], [], []>} : vector<2x2xf32>, vector<2x32xf32>, vector<2x32xf32> -> vector<2x32xf32>
    %10 = arith.negf %9 : vector<2x32xf32>
    %11 = math.exp %10 : vector<2x32xf32>
    %cst_10 = arith.constant 1.000000e+00 : f32
    %12 = vector.broadcast %cst_10 : f32 to vector<2x32xf32>
    %13 = arith.addf %12, %11 : vector<2x32xf32>
    %14 = arith.divf %12, %13 : vector<2x32xf32>
    %c0_11 = arith.constant 0 : index
    %c0_12 = arith.constant 0 : index
    %c0_13 = arith.constant 0 : index
    %15 = vector.load %arg1[%c0_11, %c0_12, %c0_13] : memref<2x32x256xf32, #tpu.memory_space<vmem>>, vector<2x32x256xf32>
    %16 = vector.shape_cast %14 : vector<2x32xf32> to vector<2x32x1xf32>
    %17 = vector.broadcast %16 : vector<2x32x1xf32> to vector<2x32x256xf32>
    %18 = arith.mulf %15, %17 : vector<2x32x256xf32>
    %c0_14 = arith.constant 0 : index
    %c0_15 = arith.constant 0 : index
    %c0_16 = arith.constant 0 : index
    %19 = vector.load %arg4[%c0_14, %c0_15, %c0_16] : memref<2x32x256xf32, #tpu.memory_space<vmem>>, vector<2x32x256xf32>
    tpu.vector_store %arg4[%c0_14, %c0_15, %c0_16], %18 {strides = array<i32>} : memref<2x32x256xf32, #tpu.memory_space<vmem>>, vector<2x32x256xf32>,
    return
  }
  func.func @transform_0(%arg0: i32) -> (i32, i32, i32) {
    %c0_i32 = arith.constant 0 : i32
    %c0_i32_0 = arith.constant 0 : i32
    %c0_i32_1 = arith.constant 0 : i32
    return %arg0, %c0_i32, %c0_i32_0 : i32, i32, i32
  }
  func.func @transform_1(%arg0: i32) -> (i32, i32) {
    %c0_i32 = arith.constant 0 : i32
    %c0_i32_0 = arith.constant 0 : i32
    %c0_i32_1 = arith.constant 0 : i32
    return %c0_i32, %c0_i32_0 : i32, i32
  }
  func.func @transform_2(%arg0: i32) -> (i32, i32) {
    %c0_i32 = arith.constant 0 : i32
    %c0_i32_0 = arith.constant 0 : i32
    %c0_i32_1 = arith.constant 0 : i32
    return %c0_i32, %c0_i32_0 : i32, i32
  }
  func.func @transform_3(%arg0: i32) -> (i32, i32, i32) {
    %c0_i32 = arith.constant 0 : i32
    %c0_i32_0 = arith.constant 0 : i32
    %c0_i32_1 = arith.constant 0 : i32
    return %arg0, %c0_i32, %c0_i32_0 : i32, i32, i32
  }
}

</mosaic_0001>

<bundles_post_ra>
// kernel: tpu_custom_call.1
= control target key start
LH: loop header
LB: loop body
LE: loop exit
PB: predicated region body
PF: predicated region fallthrough
CT: control target
= control target key end

     0   :  { %8 = vsyncpa [#allocation3], 0  ;;  %s1096_s0 = inlined_call_operand.hbm [shape: f32[8,32,256], index: 0, kind: input, shape index: {}]   ;;  %s1097_s1 = inlined_call_operand.vmem [shape: f32[32,2], index: 1, kind: input, shape index: {}]   ;;  %s1098_s2 = inlined_call_operand.vmem [shape: f32[2,32], index: 2, kind: input, shape index: {}]   ;;  %s1099_s3 = inlined_call_operand.hbm [shape: f32[8,32,256], index: 3, kind: output, shape index: {}]  }
   0x1   :  { %10 = vsyncpa [#allocation3 + $0x1], 0 }
   0x2   :  { %11 = vsyncpa [#allocation4], 0 }
   0x3   :  { %13 = vsyncpa [#allocation4 + $0x1], 0  ;;  %s842_s12 = smov 0   ;;  %s844_s13 = smov 0  }
   0x4   :  { %s846_s14 = smov 0   ;;  %s848_s15 = smov 0  }
   0x5 LB: > { %s863_s16 = sadd.s32 4294967295, %s812_s15   ;;  %s617_s17 = sadd.s32 4294967294, %s812_s15   ;;  %s812_s15 = sphi %s848_s15, %s1113_s15   ;;  %s808_s14 = sphi %s846_s14, %s1112_s14   ;;  %s804_s13 = sphi %s844_s13, %s1111_s13   ;;  %s800_s12 = sphi %s842_s12, %s1110_s12  }
   0x6   : > { %s867_s18 = sadd.s32 1, %s812_s15   ;;  %s26_s19 = sadd.s32 1, %s808_s14 }
   0x7   : > { %s23_s20 = ssub.s32 %s812_s15, %s867_s18  ;;  %p33_p0 = scmp.ne.s32.totalorder %s808_s14, %s804_s13 }
   0x8   : > { %p24_p1 = scmp.eq.s32.totalorder %s23_s20, 0  ;;  %p34_p2 = scmp.eq.s32.totalorder %s812_s15, 0 }
   0x9   : > { %p39_p3 = scmp.ne.s32.totalorder %s804_s13, %s800_s12  ;;  %p40_p4 = scmp.eq.s32.totalorder %s863_s16, 0 }
   0xa   : > { %s879_s21 = scalar_select %p24_p1, %s808_s14, %s26_s19  }
   0xb   : > { %p881_p5 = por %p34_p2, %p33_p0  ;;  %p885_p6 = por %p40_p4, %p39_p3 }
   0xc   : > { %p105_p7 = scmp.eq.s32.totalorder %s863_s16, 3  ;;  %p111_p8 = scmp.eq.s32.totalorder %s617_s17, 3 }
   0xd   : > { %s1103_s23 = scalar_select %p885_p6, 1, 0 }
   0xe   : > { %p676_p9 = scmp.lt.s32.totalorder %s812_s15, 4  ;;  %p891_p10 = por %p105_p7, %p33_p0 }
   0xf   : > { %p895_p11 = por %p111_p8, %p39_p3  ;;  %s137_s26 = sand.u32 1, %s808_s14  }
  0x10   : > { %s1104_s24 = scalar_select %p891_p10, 1, 0 }
  0x11   : > { %s1105_s25 = scalar_select %p895_p11, 1, 0 }
  0x12   : > { %s638_s27 = sshll.u32 %s812_s15, 11  ;;  %s620_s28 = sshll.u32 %s137_s26, 7 }
  0x13   : > { %s904_s4 = scalar_lea.hbm %s1096_s0, %s638_s27  ;;  %s141_s5 = scalar_lea.vmem [#allocation2], %s620_s28 }
  0x14   : > { %s149_s6 = sshll.u32 %s141_s5, 4  ;;  %p908_p12 = pnand %p676_p9, %p881_p5  ;;  %s912_s6 = int_to_ptr.vmem [resolvable:$true] %s149_s6 }
  0x15   : > { %s914_s8 = scalar_lea.sflag [#allocation3], %s137_s26  ;;  %s720_s9 = scalar_lea.hbm %s904_s4, 2048 }
  0x16   : > { %p721_p13 = scmp.ne.s32.totalorder %s904_s4, %s720_s9  ;;  %p722_p0 = pneg %p908_p12 }
  0x17   : > { %s725_s17 = scalar_lea.hbm %s1096_s0, 8192  ;;  %p726_p3 = scmp.lt.s32.totalorder %s904_s4, %s1096_s0 }
  0x18   : > { %p723_p1 = pnand %p722_p0, %p721_p13  ;;  %p727_p4 = scmp.lt.s32.totalorder %s725_s17, %s720_s9 }
  0x1a   : > { %p724_p2 = pneg %p723_p1  ;;  %p728_p5 = por %p727_p4, %p726_p3 }
  0x1c   : > { %p729_p7 = pnand %p728_p5, %p724_p2 }
  0x1e   : > { %732 = shalt.err (!%p729_p7)
}
  0x1f   : > { %s733_s22 = scalar_lea.vmem %s912_s6, 2048  ;;  %s814_s26 = smov [#allocation2]  }
  0x20   : > { %p734_p8 = scmp.ne.s32.totalorder %s912_s6, %s733_s22  ;;  %s738_s27 = sshll.u32 %s814_s26, 4  ;;  %s739_s27 = int_to_ptr.vmem [resolvable:$false] %s738_s27 }
  0x21   : > { %s740_s28 = scalar_lea.vmem %s739_s27, 4096  ;;  %p741_p1 = scmp.lt.s32.totalorder %s912_s6, %s739_s27 }
  0x22   : > { %p736_p9 = pnand %p734_p8, %p722_p0  ;;  %p742_p11 = scmp.lt.s32.totalorder %s740_s28, %s733_s22 }
  0x24   : > { %p737_p13 = pneg %p736_p9  ;;  %p743_p10 = por %p742_p11, %p741_p1 }
  0x26   : > { %p744_p6 = pnand %p743_p10, %p737_p13 }
  0x28   : > { %747 = shalt.err (!%p744_p6)
}
  0x29   : > { %s815_s29 = smov 256   ;;  %s816_s30 = smov 16  }
  0x2a   : > { %671 = dma.hbm_to_vmem [thread:$0]  (!%p908_p12), %s904_s4, 2048, %s912_s6, %s914_s8, %s815_s29, %s815_s29, %s816_s30  }
  0x2b   : > { %p624_p0 = scmp.ge.s32.totalorder %s812_s15, 1  ;;  %p157_p2 = scmp.lt.s32.totalorder %s812_s15, 5 }
  0x2d   : > { %p158_p3 = pnand %p624_p0, %p157_p2 }
  0x2e   : > { %s938_s5 = sand.u32 (!%p158_p3), 1, %s804_s13   ;;  %p1107_p6 = scmp.ne.s32.totalorder (!%p158_p3), %s1103_s23, 0 }
  0x2f   : > { %161 = sbr.rel (%p158_p3) target bundleno = 782 (0x30e), region = 32  ;;  %s625_s9 = sshll.u32 (!%p158_p3), %s938_s5, 7 }
  0x30   : > { %s164_s10 = scalar_lea.sflag (!%p158_p3), [#allocation3], %s938_s5  ;;  %s167_s11 = scalar_lea.vmem (!%p158_p3), [#allocation2], %s625_s9 }
  0x34   : > { %791 = dma.done.wait (%p1107_p6), %s164_s10, 2048  }
  0x35   : > { %793 = vsyncadd (%p1107_p6), %s164_s10, 4294965248  ;;  %v948_v0 = vld [vmem:[%s167_s11 + $0x40] sm:$0xff]  ;;  %v950_v1 = vld [vmem:[%s167_s11 + $0x48] sm:$0xff]  ;;  %v817_v24 = vmov 0.0   ;;  %vm818_vm0 = vmmov 0   ;;  %v252_v29 = vlaneseq  ;;  %vm263_vm1 = vcmask 130112  }
  0x36   : > { %v952_v2 = vld [vmem:[%s167_s11] sm:$0xff]  ;;  %v220_v3 = vadd.f32 %v950_v1, %v948_v0  ;;  %v956_v4 = vld [vmem:[%s167_s11 + $0x8] sm:$0xff]  ;;  %v958_v5 = vld [vmem:[%s167_s11 + $0x50] sm:$0xff]  ;;  %648 = vmatprep.subr.mxu0 %v817_v24  ;;  %659 = vmatprep.subr.mxu1 %v817_v24  ;;  %vm270_vm2 = vcmask 195712   ;;  %vm277_vm3 = vcmask 261312   ;;  %vm298_vm4 = vcmask 1041409  }
  0x37   : > { %v960_v6 = vld [vmem:[%s167_s11 + $0x58] sm:$0xff]  ;;  %v208_v7 = vadd.f32 %v956_v4, %v952_v2  ;;  %v964_v8 = vld [vmem:[%s167_s11 + $0x10] sm:$0xff]  ;;  %v972_v12 = vld [vmem:[%s167_s11 + $0x60] sm:$0xff]  ;;  %656 = vmatprep.mubr.msk.f32.mxu0 %vm818_vm0, %v817_v24  ;;  %661 = vmatprep.mubr.msk.f32.mxu1 %vm818_vm0, %v817_v24  ;;  %v253_v31 = vand.u32 127, %v252_v29  ;;  %v255_v36 = vshrl.u32 %v252_v29, 7  ;;  %vm300_vm5 = vcmask 261120  }
  0x38   : > { %v966_v9 = vld [vmem:[%s167_s11 + $0x18] sm:$0xff]  ;;  %221 = vadd.xlane.f32.xlu1 %v220_v3  ;;  %v223_v10 = vadd.f32 %v960_v6, %v958_v5  ;;  %v974_v13 = vld [vmem:[%s167_s11 + $0x68] sm:$0xff]  ;;  %v976_v14 = vld [vmem:[%s167_s11 + $0x20] sm:$0xff]  ;;  %vm379_vm6 = vcmask 1041408   ;;  %vm375_vm7 = vcmask 15360   ;;  %s1017_s27 = scalar_lea.vmem [#allocation5], %s625_s9 }
  0x39   : > { %209 = vadd.xlane.f32.xlu0 %v208_v7  ;;  %v211_v11 = vadd.f32 %v966_v9, %v964_v8  ;;  %v978_v15 = vld [vmem:[%s167_s11 + $0x28] sm:$0xff]  ;;  %v226_v16 = vadd.f32 %v974_v13, %v972_v12  ;;  %v984_v18 = vld [vmem:[%s167_s11 + $0x70] sm:$0xff]  ;;  %v986_v19 = vld [vmem:[%s167_s11 + $0x78] sm:$0xff]  ;;  %v258_v33 = vadd.s32 4294967288, %v253_v31  ;;  %v265_v35 = vadd.s32 4294967280, %v253_v31  ;;  %s640_s28 = sshll.u32 %s863_s16, 11 }
  0x3a   : > { %v214_v17 = vadd.f32 %v978_v15, %v976_v14  ;;  %v988_v20 = vld [vmem:[%s167_s11 + $0x30] sm:$0xff]  ;;  %v990_v21 = vld [vmem:[%s167_s11 + $0x38] sm:$0xff]  ;;  %v229_v22 = vadd.f32 %v986_v19, %v984_v18  ;;  %v241_v27 = vld [vmem:[%s1097_s1 + $0x8] sm:$0xff]  ;;  %v272_v40 = vadd.s32 4294967272, %v253_v31  ;;  %v256_v44 = vsub.s32 %v253_v31, %v255_v36  ;;  %s544_s29 = sshll.u32 %s1017_s27, 4  ;;  %s1048_s10 = scalar_lea.hbm %s1099_s3, %s640_s28  ;;  %s1050_s29 = int_to_ptr.vmem [resolvable:$true] %s544_s29 }
  0x3b   : > { %v217_v23 = vadd.f32 %v990_v21, %v988_v20  ;;  %v243_v25 = vld [vmem:[%s1097_s1 + $0x18] sm:$0xff]  ;;  %v242_v26 = vld [vmem:[%s1097_s1 + $0x10] sm:$0xff]  ;;  %v240_v28 = vld [vmem:[%s1097_s1] sm:$0xff]  ;;  %v261_v38 = vsub.s32 %v258_v33, %v255_v36  ;;  %v268_v42 = vsub.s32 %v265_v35, %v255_v36  ;;  %v461_v31 = vsub.s32 0, %v255_v36  ;;  %s530_s16 = scalar_lea.sflag [#allocation4], %s938_s5  ;;  %s748_s11 = scalar_lea.vmem %s1050_s29, 2048 }
  0x3c   : > { %224 = vadd.xlane.f32.xlu1 %v223_v10  ;;  %649 = vmatpush3.msra.mxu0 %v243_v25  ;;  %v275_v51 = vsub.s32 %v272_v40, %v255_v36  ;;  %p749_p10 = scmp.ne.s32.totalorder %s1050_s29, %s748_s11  ;;  %p1108_p11 = scmp.ne.s32.totalorder %s1104_s24, 0 }
  0x3d   : > { %212 = vadd.xlane.f32.xlu0 %v211_v11  ;;  %650 = vmatprep.subr.mxu0 %v817_v24  ;;  %s819_s23 = smov [#allocation5]  }
  0x3e   : > { %651 = vmatpush3.msra.mxu0 %v242_v26  ;;  %p750_p12 = pnand %p749_p10, %p1108_p11  ;;  %s752_s4 = sshll.u32 %s819_s23, 4  ;;  %s753_s4 = int_to_ptr.vmem [resolvable:$false] %s752_s4 }
  0x3f   : > { %652 = vmatprep.subr.mxu0 %v817_v24  ;;  %s754_s6 = scalar_lea.vmem %s753_s4, 4096  ;;  %p755_p5 = scmp.lt.s32.totalorder %s1050_s29, %s753_s4 }
  0x40   : > { %227 = vadd.xlane.f32.xlu1 %v226_v16  ;;  %653 = vmatpush3.msra.mxu0 %v241_v27  ;;  %p751_p4 = pneg %p750_p12  ;;  %p756_p7 = scmp.lt.s32.totalorder %s754_s6, %s748_s11 }
  0x41   : > { %215 = vadd.xlane.f32.xlu0 %v214_v17  ;;  %654 = vmatprep.subr.mxu0 %v817_v24 }
  0x42   : > { %655 = vmatpush3.msra.mxu0 %v240_v28  ;;  %p757_p8 = por %p756_p7, %p755_p5 }
  0x44   : > { %230 = vadd.xlane.f32.xlu1 %v229_v22  ;;  %v374_v22 = vld [vmem:[%s1098_s2] sm:$0x3]  ;;  %p758_p9 = pnand %p757_p8, %p751_p4 }
  0x45   : > { %218 = vadd.xlane.f32.xlu0 %v217_v23  ;;  %660 = vmatpush3.msk.msra.mxu1 %vm379_vm6, %v374_v22 }
  0xc1   : > { %v222_v30 = vpop.xlane.xlu1 %221 }
  0xc2   : > { %v210_v32 = vpop.xlane.xlu0 %209  ;;  %v236_v45 = vmul.f32 0.00390625, %v222_v30 }
  0xc3   : > { %v232_v48 = vmul.f32 0.00390625, %v210_v32 }
  0xc4   : > { %v282_v55 = vrot.slane %v236_v45, %v256_v44 }
  0xc5   : > { %v225_v34 = vpop.xlane.xlu1 %224  ;;  %v257_v59 = vrot.slane %v232_v48, %v256_v44 }
  0xc6   : > { %v213_v37 = vpop.xlane.xlu0 %212  ;;  %v237_v39 = vmul.f32 0.00390625, %v225_v34  ;;  %v480_v34 = vsub.s32 1, %v255_v36 }
  0xc7   : > { %v233_v41 = vmul.f32 0.00390625, %v213_v37 }
  0xc8   : > { %v286_v50 = vrot.slane %v237_v39, %v261_v38 }
  0xc9   : > { %v228_v43 = vpop.xlane.xlu1 %227  ;;  %v262_v52 = vrot.slane %v233_v41, %v261_v38 }
  0xca   : > { %v238_v46 = vmul.f32 0.00390625, %v228_v43  ;;  %v216_v47 = vpop.xlane.xlu0 %215  ;;  %v287_v61 = vsel %vm263_vm1, %v286_v50, %v282_v55 }
  0xcb   : > { %v234_v49 = vmul.f32 0.00390625, %v216_v47  ;;  %v264_v63 = vsel %vm263_vm1, %v262_v52, %v257_v59 }
  0xcc   : > { %v291_v53 = vrot.slane %v238_v46, %v268_v42 }
  0xcd   : > { %v231_v54 = vpop.xlane.xlu1 %230  ;;  %v269_v56 = vrot.slane %v234_v49, %v268_v42 }
  0xce   : > { %v239_v57 = vmul.f32 0.00390625, %v231_v54  ;;  %v219_v58 = vpop.xlane.xlu0 %218  ;;  %v292_v3 = vsel %vm270_vm2, %v291_v53, %v287_v61 }
  0xcf   : > { %v235_v60 = vmul.f32 0.00390625, %v219_v58  ;;  %v271_v10 = vsel %vm270_vm2, %v269_v56, %v264_v63 }
  0xd0   : > { %v296_v62 = vrot.slane %v239_v57, %v275_v51 }
  0xd1   : > { %v276_v7 = vrot.slane %v235_v60, %v275_v51 }
  0xd2   : > { %v297_v11 = vsel %vm277_vm3, %v296_v62, %v292_v3 }
  0xd3   : > { %v278_v16 = vsel %vm277_vm3, %v276_v7, %v271_v10 }
  0xd4   : > { %v299_v17 = vsel %vm298_vm4, %v297_v11, %v278_v16 }
  0xd5   : > { %657 = vmatmul.mubr.msk.f32.vlgmr.msra.gmra.mxu0 %vm300_vm5, %v299_v17 }
 0x195   : > { %v369_v23 = vpop.f32.mrf.mxu0 }
 0x196   : > { %v373_v24 = vmax.f32 %v369_v23, 0.0 }
 0x197   : > { %v658_v25 = vpop.f32.mrf.mxu0 }
 0x198   : > { %662 = vmatmul.mubr.msk.f32.vlgmr.msra.gmra.mxu1 %vm375_vm7, %v373_v24 }
 0x258   : > { %v449_v26 = vpop.f32.mrf.mxu1 }
 0x259   : > { %v630_v27 = vmul.f32 -1.442695, %v449_v26 }
 0x25a   : > { %v663_v28 = vpop.f32.mrf.mxu1 }
 0x25b   : > { %716 = vpow2.f32 %v630_v27 }
 0x268   : > { %v717_v29 = vpop.eup %716 }
 0x269   : > { %v456_v30 = vadd.f32 1.0, %v717_v29 }
 0x26b   : > { %718 = vrcp.f32 %v456_v30 }
 0x278   : > { %v719_v32 = vpop.eup %718 }
 0x279   : > { %v462_v33 = vrot.slane %v719_v32, %v461_v31  ;;  %v481_v35 = vrot.slane %v719_v32, %v480_v34 }
 0x27b   : > { %468 = vbcast.lane.b32.xlu1 %v462_v33, 264  ;;  %464 = vbcast.lane.b32.xlu0 %v462_v33, 256 }
 0x27f   : > { %472 = vbcast.lane.b32.xlu1 %v462_v33, 272  ;;  %483 = vbcast.lane.b32.xlu0 %v481_v35, 256 }
 0x283   : > { %476 = vbcast.lane.b32.xlu1 %v462_v33, 280  ;;  %491 = vbcast.lane.b32.xlu0 %v481_v35, 272 }
 0x287   : > { %487 = vbcast.lane.b32.xlu1 %v481_v35, 264 }
 0x28b   : > { %495 = vbcast.lane.b32.xlu1 %v481_v35, 280 }
 0x2ed   : > { %v469_v37 = vpop.permute.xlu1 %468  ;;  %v465_v38 = vpop.permute.xlu0 %464 }
 0x2ee   : > { %v499_v39 = vmul.f32 %v469_v37, %v964_v8  ;;  %v500_v40 = vmul.f32 %v469_v37, %v966_v9  ;;  %v497_v41 = vmul.f32 %v465_v38, %v952_v2  ;;  %v498_v36 = vmul.f32 %v465_v38, %v956_v4 }
 0x2f0   : > { %515 = vst [vmem:[%s1017_s27 + $0x10] sm:$0xff] %v499_v39  ;;  %516 = vst [vmem:[%s1017_s27 + $0x18] sm:$0xff] %v500_v40 }
 0x2f1   : > { %513 = vst [vmem:[%s1017_s27] sm:$0xff] %v497_v41  ;;  %514 = vst [vmem:[%s1017_s27 + $0x8] sm:$0xff] %v498_v36  ;;  %v473_v8 = vpop.permute.xlu1 %472  ;;  %v484_v2 = vpop.permute.xlu0 %483 }
 0x2f2   : > { %v501_v4 = vmul.f32 %v473_v8, %v976_v14  ;;  %v502_v9 = vmul.f32 %v473_v8, %v978_v15  ;;  %v505_v42 = vmul.f32 %v484_v2, %v948_v0  ;;  %v506_v43 = vmul.f32 %v484_v2, %v950_v1 }
 0x2f4   : > { %517 = vst [vmem:[%s1017_s27 + $0x20] sm:$0xff] %v501_v4  ;;  %518 = vst [vmem:[%s1017_s27 + $0x28] sm:$0xff] %v502_v9 }
 0x2f5   : > { %521 = vst [vmem:[%s1017_s27 + $0x40] sm:$0xff] %v505_v42  ;;  %522 = vst [vmem:[%s1017_s27 + $0x48] sm:$0xff] %v506_v43  ;;  %v477_v44 = vpop.permute.xlu1 %476  ;;  %v492_v45 = vpop.permute.xlu0 %491 }
 0x2f6   : > { %v503_v14 = vmul.f32 %v477_v44, %v988_v20  ;;  %v504_v46 = vmul.f32 %v477_v44, %v990_v21  ;;  %v509_v15 = vmul.f32 %v492_v45, %v972_v12  ;;  %v510_v0 = vmul.f32 %v492_v45, %v974_v13 }
 0x2f8   : > { %519 = vst [vmem:[%s1017_s27 + $0x30] sm:$0xff] %v503_v14  ;;  %520 = vst [vmem:[%s1017_s27 + $0x38] sm:$0xff] %v504_v46 }
 0x2f9   : > { %525 = vst [vmem:[%s1017_s27 + $0x60] sm:$0xff] %v509_v15  ;;  %526 = vst [vmem:[%s1017_s27 + $0x68] sm:$0xff] %v510_v0  ;;  %v488_v1 = vpop.permute.xlu1 %487 }
 0x2fa   : > { %v507_v47 = vmul.f32 %v488_v1, %v958_v5  ;;  %v508_v48 = vmul.f32 %v488_v1, %v960_v6 }
 0x2fc   : > { %523 = vst [vmem:[%s1017_s27 + $0x50] sm:$0xff] %v507_v47  ;;  %524 = vst [vmem:[%s1017_s27 + $0x58] sm:$0xff] %v508_v48 }
 0x2fd   : > { %v496_v12 = vpop.permute.xlu1 %495 }
 0x2fe   : > { %v511_v5 = vmul.f32 %v496_v12, %v984_v18  ;;  %v512_v13 = vmul.f32 %v496_v12, %v986_v19 }
 0x300   : > { %527 = vst [vmem:[%s1017_s27 + $0x70] sm:$0xff] %v511_v5  ;;  %528 = vst [vmem:[%s1017_s27 + $0x78] sm:$0xff] %v512_v13 }
 0x301   : > { %761 = shalt.err (!%p758_p9)
}
 0x302   : > { %s762_s7 = scalar_lea.hbm %s1048_s10, 2048  ;;  %s766_s19 = scalar_lea.hbm %s1099_s3, 8192 }
 0x303   : > { %p763_p13 = scmp.ne.s32.totalorder %s1048_s10, %s762_s7  ;;  %p767_p2 = scmp.lt.s32.totalorder %s1048_s10, %s1099_s3 }
 0x304   : > { %p768_p3 = scmp.lt.s32.totalorder %s766_s19, %s762_s7 }
 0x305   : > { %p764_p1 = pnand %p763_p13, %p1108_p11 }
 0x306   : > { %p769_p6 = por %p768_p3, %p767_p2 }
 0x307   : > { %p765_p0 = pneg %p764_p1 }
 0x309   : > { %p770_p10 = pnand %p769_p6, %p765_p0 }
 0x30b   : > { %773 = shalt.err (!%p770_p10)
}
 0x30c   : > { %s820_s26 = smov 256   ;;  %s821_s27 = smov 16  }
 0x30d   : > { %666 = dma.vmem_to_hbm [thread:$0]  (%p1108_p11), %s1050_s29, 2048, %s1048_s10, %s530_s16, %s820_s26, %s820_s26, %s821_s27  }
 0x30e PF: > { %p677_p12 = scmp.ge.s32.totalorder %s812_s15, 2  ;;  %s559_s28 = sand.u32 1, %s800_s12  }
 0x30f   : > { %p1109_p4 = scmp.ne.s32.totalorder %s1105_s25, 0  ;;  %s560_s30 = scalar_lea.sflag [#allocation4], %s559_s28 }
 0x311   : > { %p673_p5 = pnand %p677_p12, %p1109_p4 }
 0x313   : > { %p674_p7 = pneg %p673_p5 }
 0x315   : > { %795 = dma.done.wait (%p674_p7), %s560_s30, 2048  }
 0x316   : > { %797 = vsyncadd (%p674_p7), %s560_s30, 4294965248  ;;  %p16_p8 = scmp.ge.s32.totalorder %s867_s18, 6   ;;  %s1110_s12 = smov %s804_s13 }
 0x317   : > { %s1111_s13 = smov %s808_s14  ;;  %s1112_s14 = smov %s879_s21 }
 0x318   : > { %s1113_s15 = smov %s867_s18  ;;  %18 = sbr.rel (!%p16_p8) target bundleno = 5 (0x5), region = 77 }
 0x31d   :  { %565 = vsyncpa [#allocation3], 1 }
 0x31e   :  { %567 = vsyncpa [#allocation3 + $0x1], 1 }
 0x31f   :  { %568 = vsyncpa [#allocation4], 1 }
 0x320   :  { %570 = vsyncpa [#allocation4 + $0x1], 1 }

</bundles_post_ra>
